<compile_context>
chip_gen: v7x
topology: tpu7x:2x2x1
jax: 0.10.0
libtpu: 0.0.40
codegen_flags: <defaults>
</compile_context>

<pallas_src>
import math

import jax
import jax.numpy as jnp
from jax.experimental import pallas as pl
from jax.experimental.pallas import tpu as pltpu


def _round_up(x, m):
    return -(-x // m) * m


def _round_down(x, m):
    return (x // m) * m


def make_positional_encoding(emb_dim: int, max_len: int = 1000) -> jnp.ndarray:
    """Deterministic buffer init mirroring the PyTorch __init__ (odd-emb_dim safe)."""
    position = jnp.arange(0, max_len, dtype=jnp.float32)[:, None]            # (max_len, 1)
    div_term = jnp.exp(
        jnp.arange(0, emb_dim, 2, dtype=jnp.float32) * (-(math.log(10000.0) / emb_dim))
    )
    angles = position * div_term                                             # (max_len, ceil(D/2))
    pe = jnp.zeros((max_len, emb_dim), dtype=jnp.float32)
    pe = pe.at[:, 0::2].set(jnp.sin(angles))
    pe = pe.at[:, 1::2].set(jnp.cos(angles[:, : emb_dim // 2]))
    return pe                                                                # (max_len, emb_dim)


def flatten_pe(pe: jnp.ndarray, seq_len: int) -> jnp.ndarray:
    """Hoisted out of the hot path: slice + flatten pe once per seq_len (stays float32)."""
    return pe[:seq_len, :].reshape(-1)                                       # (S*D,)


def _vmem_budget_and_limit():
    # v7x-safe defaults (64 MiB physical VMEM per TC); raise only on 128 MiB parts.
    budget, limit = 12 * 1024 * 1024, 32 * 1024 * 1024
    try:
        cap = pltpu.get_tpu_info().vmem_capacity_bytes
        if cap >= 96 * 1024 * 1024:                      # v5e / v6e: bigger tiles, fewer steps
            budget, limit = 24 * 1024 * 1024, 64 * 1024 * 1024
    except Exception:
        pass                                             # unknown part: keep safe defaults
    return budget, limit


def _row_fold(B, NC, min_sub):
    """For B < min_sub, find r dividing NC with r >= min_sub so the folded middle dim fills
    whole vregs. Prefer r a multiple of min_sub and NC//r a multiple of 128 (lane-dense)."""
    if B >= min_sub or NC < min_sub:
        return 1
    best, best_score = 1, -1
    for r in range(min_sub, min(NC, 8 * min_sub) + 1):
        if NC % r:
            continue
        score = 2 * (r % min_sub == 0) + ((NC // r) % 128 == 0)
        if score > best_score:
            best, best_score = r, score
        if score == 3:
            break
    return best


def _choose_tiles_2d(R, NC2, x_it, out_it, pe_it, budget):
    """2-D view (R, NC2): pick (TB, TC) so double-buffered, sublane-PADDED x/out/pe blocks
    fit `budget`. pe block is (1, TC) and pads to 8 rows in VMEM."""
    sub_x = max(8, 32 // x_it)           # f32 -> 8, bf16 -> 16, int8/fp8 -> 32 sublanes/tile
    sub_o = max(8, 32 // out_it)
    pe_pad = max(8, 32 // pe_it)         # (1, TC) pe block pads to a full sublane tile

    def per_col_bytes(tb):
        return 2 * (_round_up(tb, sub_x) * x_it
                    + _round_up(tb, sub_o) * out_it
                    + pe_pad * pe_it)

    def fits(tb, tc):
        return per_col_bytes(tb) * tc <= budget

    def max_tc(tb):
        t = budget // per_col_bytes(tb)
        if t >= NC2:
            return NC2
        return min(NC2, max(_round_down(t, 128), 128))

    if fits(R, NC2):                                     # whole array as one tile
        return R, NC2
    if fits(R, min(NC2, 512)):                           # full rows, lane-dense column bands
        return R, max_tc(R)
    # Tall row dimension: fix a lane-dense column width and size rows from the budget
    # (no arbitrary row cap -- tiles land in the ~1-8 MiB roofline plateau).
    tc = NC2 if NC2 <= 2048 else 2048
    tb = (budget - 2 * tc * pe_pad * pe_it) // (2 * tc * (x_it + out_it))
    tb = min(R, max(sub_x, _round_down(tb, sub_x)))
    return tb, tc


def _ensure_two_tiles_2d(TB, TC, R, NC2, x_bytes_total):
    """v7x has 2 TensorCores; split a large single-tile grid so both can stream."""
    n_tiles = (-(-R // TB)) * (-(-NC2 // TC))
    if n_tiles >= 2 or x_bytes_total < (1 << 20):
        return TB, TC
    if NC2 >= 256:
        return TB, max(128, _round_down(TC // 2, 128))
    if R >= 16:
        return max(8, _round_down(TB // 2, 8)), TC
    return TB, TC


def _make_kernel(out_dtype):
    """Rank-agnostic streaming add: pe block broadcasts over the batch/row dims."""
    def kernel(x_ref, pe_ref, o_ref):
        o_ref[...] = (x_ref[...].astype(jnp.float32)
                      + pe_ref[...].astype(jnp.float32)).astype(out_dtype)
    return kernel


def positional_encoding_forward(x: jnp.ndarray, pe_flat: jnp.ndarray) -> jnp.ndarray:
    """x: (B, S, D); pe_flat: (S*D,) from flatten_pe(). Returns x + pe (broadcast over batch)."""
    B, S, D = x.shape
    NC = S * D
    if pe_flat.shape != (NC,):
        raise ValueError(f"pe_flat must have shape ({NC},), got {pe_flat.shape}")

    out_dtype = jnp.promote_types(x.dtype, pe_flat.dtype)    # PyTorch promotion semantics
    x_it = jnp.dtype(x.dtype).itemsize
    out_it = jnp.dtype(out_dtype).itemsize
    pe_it = jnp.dtype(pe_flat.dtype).itemsize

    budget, vmem_limit = _vmem_budget_and_limit()
    min_sub = max(8, 32 // x_it)
    r = _row_fold(B, NC, min_sub)

    if r == 1:
        # 2-D lane-dense view: (B, S*D); pe is a (1, TC) sublane broadcast.
        R, NC2 = B, NC
        x_view = x.reshape(R, NC2)                                   # metadata-only reshape
        pe_view = pe_flat.reshape(1, NC2)
        TB, TC = _choose_tiles_2d(R, NC2, x_it, out_it, pe_it, budget)
        TB, TC = _ensure_two_tiles_2d(TB, TC, R, NC2, R * NC2 * x_it)
        grid = (-(-R // TB), -(-NC2 // TC))                          # rows outer, cols inner
        in_specs = [pl.BlockSpec((TB, TC), lambda b, c: (b, c)),     # x row/column tile
                    pl.BlockSpec((1, TC), lambda b, c: (0, c))]      # pe column band
        out_spec = pl.BlockSpec((TB, TC), lambda b, c: (b, c))
        out_view_shape = (R, NC2)
        dim_sem = ("parallel", "parallel")
    else:
        # Small batch: fold r (>= 8/16, divides S*D) columns into a full-sublane middle dim.
        NC2 = NC // r
        x_view = x.reshape(B, r, NC2)
        pe_view = pe_flat.reshape(r, NC2)
        sub_x = max(8, 32 // x_it)
        sub_o = max(8, 32 // out_it)
        sub_p = max(8, 32 // pe_it)
        per_col = 2 * (B * _round_up(r, sub_x) * x_it
                       + B * _round_up(r, sub_o) * out_it
                       + _round_up(r, sub_p) * pe_it)
        t = budget // per_col
        TC = NC2 if t >= NC2 else min(NC2, max(_round_down(t, 128), 128))
        # v7x: keep both TensorCores busy on large inputs.
        if (-(-NC2 // TC)) < 2 and NC2 >= 256 and B * NC * x_it >= (1 << 20):
            TC = max(128, _round_down(TC // 2, 128))
        grid = (-(-NC2 // TC),)
        in_specs = [pl.BlockSpec((B, r, TC), lambda c: (0, 0, c)),
                    pl.BlockSpec((r, TC), lambda c: (0, c))]
        out_spec = pl.BlockSpec((B, r, TC), lambda c: (0, 0, c))
        out_view_shape = (B, r, NC2)
        dim_sem = ("parallel",)

    out2 = pl.pallas_call(
        _make_kernel(out_dtype),
        out_shape=jax.ShapeDtypeStruct(out_view_shape, out_dtype),
        grid_spec=pltpu.PrefetchScalarGridSpec(
            num_scalar_prefetch=0,
            grid=grid,
            in_specs=in_specs,
            out_specs=out_spec,
        ),
        compiler_params=pltpu.CompilerParams(
            dimension_semantics=dim_sem,
            vmem_limit_bytes=vmem_limit,
        ),
    )(x_view, pe_view)

    return out2.reshape(B, S, D)


if __name__ == "__main__":
    max_len = 1000
    batch, seq_len, emb_dim = 2, 8, 32

    key = jax.random.PRNGKey(0)
    x = jax.random.normal(key, (batch, seq_len, emb_dim), dtype=jnp.float32)
    pe = make_positional_encoding(emb_dim, max_len)
    pe_flat = flatten_pe(pe, seq_len)            # hoisted out of the per-call hot path

    # small-batch (folded) path
    out = jax.block_until_ready(positional_encoding_forward(x, pe_flat))
    ref = x + pe[None, :seq_len, :]
    assert out.shape == (batch, seq_len, emb_dim) and out.dtype == ref.dtype
    assert jnp.allclose(out, ref, atol=1e-6), "mismatch vs reference (folded path)"

    # larger-batch (broadcast) path
    x_big = jax.random.normal(jax.random.PRNGKey(0), (16, seq_len, emb_dim), jnp.float32)
    out_big = jax.block_until_ready(positional_encoding_forward(x_big, pe_flat))
    ref_big = x_big + pe[None, :seq_len, :]
    assert jnp.allclose(out_big, ref_big, atol=1e-6), "mismatch vs reference (broadcast path)"

    print("KERNEL_OK")
</pallas_src>

<mosaic_0001>
module attributes {stable_mosaic.version = 11 : i64} {
  func.func @kernel(%arg0: i32, %arg1: memref<2x8x32xf32, #tpu.memory_space<vmem>>, %arg2: memref<8x32xf32, #tpu.memory_space<vmem>>, %arg3: memref<2x8x32xf32, #tpu.memory_space<vmem>>) attributes {dimension_semantics = [#tpu.dimension_semantics<parallel>], iteration_bounds = array<i64: 1>, scalar_prefetch = 0 : i64, scratch_operands = 0 : i64, tpu.core_type = #tpu.core_type<tc>, window_params = [{transform_indices = @transform_0, window_bounds = array<i64: 2, 8, 32>}, {transform_indices = @transform_1, window_bounds = array<i64: 8, 32>}, {transform_indices = @transform_2, window_bounds = array<i64: 2, 8, 32>}]} {
    %c0 = arith.constant 0 : index
    %c0_0 = arith.constant 0 : index
    %c0_1 = arith.constant 0 : index
    %0 = vector.load %arg1[%c0, %c0_0, %c0_1] : memref<2x8x32xf32, #tpu.memory_space<vmem>>, vector<2x8x32xf32>
    %c0_2 = arith.constant 0 : index
    %c0_3 = arith.constant 0 : index
    %1 = vector.load %arg2[%c0_2, %c0_3] : memref<8x32xf32, #tpu.memory_space<vmem>>, vector<8x32xf32>
    %2 = vector.shape_cast %1 : vector<8x32xf32> to vector<1x8x32xf32>
    %3 = vector.broadcast %2 : vector<1x8x32xf32> to vector<2x8x32xf32>
    %4 = arith.addf %0, %3 : vector<2x8x32xf32>
    %c0_4 = arith.constant 0 : index
    %c0_5 = arith.constant 0 : index
    %c0_6 = arith.constant 0 : index
    %5 = vector.load %arg3[%c0_4, %c0_5, %c0_6] : memref<2x8x32xf32, #tpu.memory_space<vmem>>, vector<2x8x32xf32>
    tpu.vector_store %arg3[%c0_4, %c0_5, %c0_6], %4 {strides = array<i32>} : memref<2x8x32xf32, #tpu.memory_space<vmem>>, vector<2x8x32xf32>,
    return
  }
  func.func @transform_0(%arg0: i32) -> (i32, i32, i32) {
    %c0_i32 = arith.constant 0 : i32
    %c0_i32_0 = arith.constant 0 : i32
    %c0_i32_1 = arith.constant 0 : i32
    return %c0_i32, %c0_i32_0, %arg0 : i32, i32, i32
  }
  func.func @transform_1(%arg0: i32) -> (i32, i32) {
    %c0_i32 = arith.constant 0 : i32
    %c0_i32_0 = arith.constant 0 : i32
    return %c0_i32, %arg0 : i32, i32
  }
  func.func @transform_2(%arg0: i32) -> (i32, i32, i32) {
    %c0_i32 = arith.constant 0 : i32
    %c0_i32_0 = arith.constant 0 : i32
    %c0_i32_1 = arith.constant 0 : i32
    return %c0_i32, %c0_i32_0, %arg0 : i32, i32, i32
  }
}

</mosaic_0001>

<bundles_post_ra>
// kernel: tpu_custom_call.1
= control target key start
LH: loop header
LB: loop body
LE: loop exit
PB: predicated region body
PF: predicated region fallthrough
CT: control target
= control target key end

     0   :  { %7 = vsyncpa [#allocation3], 0  ;;  %s203_s0 = inlined_call_operand.hbm [shape: f32[2,8,32], index: 0, kind: input, shape index: {}]   ;;  %s204_s1 = inlined_call_operand.hbm [shape: f32[8,32], index: 1, kind: input, shape index: {}]   ;;  %s205_s2 = inlined_call_operand.hbm [shape: f32[2,8,32], index: 2, kind: output, shape index: {}]  }
   0x1   :  { %8 = vsyncpa [#allocation6], 0 }
   0x2   :  { %9 = vsyncpa [#allocation4], 0  ;;  %s141_s9 = smov [#allocation2]   ;;  %s69_s13 = scalar_lea.hbm %s203_s0, 256 }
   0x3   :  { %s15_s10 = sshll.u32 %s141_s9, 4  ;;  %p70_p0 = scmp.ne.s32.totalorder %s203_s0, %s69_s13  ;;  %s16_s10 = int_to_ptr.vmem [resolvable:$true] %s15_s10 }
   0x4   :  { %p73_p1 = scmp.lt.u32.totalorder %s69_s13, %s203_s0 }
   0x6   :  { %p75_p2 = pnand %p73_p1, %p70_p0 }
   0x8   :  { %78 = shalt.err (!%p75_p2)
}
   0x9   :  { %s79_s18 = scalar_lea.vmem %s16_s10, 256  ;;  %p84_p4 = scmp.lt.s32.totalorder %s16_s10, %s16_s10 }
   0xa   :  { %p80_p3 = scmp.ne.s32.totalorder %s16_s10, %s79_s18  ;;  %p85_p5 = scmp.lt.s32.totalorder %s79_s18, %s79_s18 }
   0xc   :  { %p86_p6 = por %p85_p5, %p84_p4 }
   0xe   :  { %p87_p7 = pnand %p86_p6, %p80_p3 }
  0x10   :  { %90 = shalt.err (!%p87_p7)
}
  0x11   :  { %s142_s19 = smov 128   ;;  %s143_s20 = smov 8  }
  0x12   :  { %21 = dma.hbm_to_vmem [thread:$0]  %s203_s0, 256, %s16_s10, [#allocation3], %s142_s19, %s142_s19, %s143_s20  }
  0x13   :  { %s144_s23 = smov [#allocation5]   ;;  %s91_s27 = scalar_lea.hbm %s204_s1, 128 }
  0x14   :  { %s28_s24 = sshll.u32 %s144_s23, 4  ;;  %p92_p8 = scmp.ne.s32.totalorder %s204_s1, %s91_s27  ;;  %s29_s24 = int_to_ptr.vmem [resolvable:$true] %s28_s24 }
  0x15   :  { %p95_p9 = scmp.lt.u32.totalorder %s91_s27, %s204_s1 }
  0x17   :  { %p97_p10 = pnand %p95_p9, %p92_p8 }
  0x19   :  { %100 = shalt.err (!%p97_p10)
}
  0x1a   :  { %s101_s4 = scalar_lea.vmem %s29_s24, 128  ;;  %p106_p12 = scmp.lt.s32.totalorder %s29_s24, %s29_s24 }
  0x1b   :  { %p102_p11 = scmp.ne.s32.totalorder %s29_s24, %s101_s4  ;;  %p107_p13 = scmp.lt.s32.totalorder %s101_s4, %s101_s4 }
  0x1d   :  { %p108_p0 = por %p107_p13, %p106_p12 }
  0x1f   :  { %p109_p1 = pnand %p108_p0, %p102_p11 }
  0x21   :  { %112 = shalt.err (!%p109_p1)
}
  0x22   :  { %31 = dma.hbm_to_vmem [thread:$0]  %s204_s1, 128, %s29_s24, [#allocation6]  }
  0x23   :  { %135 = dma.done.wait [#allocation3], 256  }
  0x24   :  { %136 = vsyncadd [#allocation3], 4294967040 }
  0x25   :  { %137 = dma.done.wait [#allocation6], 128  }
  0x26   :  { %138 = vsyncadd [#allocation6], 4294967168  ;;  %s145_s6 = smov [#allocation7]   ;;  %v38_v0 = vld [vmem:[#allocation2] sm:$0xff]  ;;  %v40_v1 = vld [vmem:[#allocation5] sm:$0xff]  ;;  %vm43_vm0 = vcmask 261120  }
  0x27   :  { %s51_s7 = sshll.u32 %s145_s6, 4  ;;  %v39_v2 = vld [vmem:[#allocation2 + $0x8] sm:$0xff]  ;;  %v41_v3 = vadd.f32 %v40_v1, %v38_v0  ;;  %s52_s7 = int_to_ptr.vmem [resolvable:$true] %s51_s7 }
  0x28   :  { %v42_v4 = vadd.f32 %v40_v1, %v39_v2  ;;  %s113_s8 = scalar_lea.vmem %s52_s7, 256  ;;  %p118_p3 = scmp.lt.s32.totalorder %s52_s7, %s52_s7 }
  0x29   :  { %44 = vst.msk [vmem:[#allocation7] sm:$0xff] %vm43_vm0, %v41_v3  ;;  %p114_p2 = scmp.ne.s32.totalorder %s52_s7, %s113_s8  ;;  %p119_p4 = scmp.lt.s32.totalorder %s113_s8, %s113_s8 }
  0x2a   :  { %45 = vst.msk [vmem:[#allocation7 + $0x8] sm:$0xff] %vm43_vm0, %v42_v4 }
  0x2b   :  { %p120_p5 = por %p119_p4, %p118_p3 }
  0x2d   :  { %p121_p6 = pnand %p120_p5, %p114_p2 }
  0x2f   :  { %124 = shalt.err (!%p121_p6)
}
  0x30   :  { %s125_s10 = scalar_lea.hbm %s205_s2, 256 }
  0x31   :  { %p126_p7 = scmp.ne.s32.totalorder %s205_s2, %s125_s10  ;;  %p129_p8 = scmp.lt.u32.totalorder %s125_s10, %s205_s2 }
  0x33   :  { %p131_p9 = pnand %p129_p8, %p126_p7 }
  0x35   :  { %134 = shalt.err (!%p131_p9)
}
  0x36   :  { %57 = dma.vmem_to_hbm [thread:$0]  %s52_s7, 256, %s205_s2, [#allocation4], %s142_s19, %s142_s19, %s143_s20  }
  0x37   :  { %139 = dma.done.wait [#allocation4], 256  }
  0x38   :  { %140 = vsyncadd [#allocation4], 4294967040 }
  0x39   :  { %61 = vsyncpa [#allocation3], 1 }
  0x3a   :  { %62 = vsyncpa [#allocation6], 1 }
  0x3b   :  { %63 = vsyncpa [#allocation4], 1 }

</bundles_post_ra>
